<compile_context>
chip_gen: v6e
topology: v6e:2x2x1
jax: 0.10.0
libtpu: 0.0.40
codegen_flags: <defaults>
</compile_context>

<pallas_src>
import math
import functools

import jax
import jax.numpy as jnp
from jax.experimental import pallas as pl
from jax.experimental.pallas import tpu as pltpu


def _round_up(n, m):
    return ((n + m - 1) // m) * m


def _policy_kernel(num_hidden, *refs):
    """refs = x, (w_i, b_i) * num_hidden, w_mu, b_mu, mu_out."""
    x_ref = refs[0]
    h = x_ref[...]
    idx = 1
    # hidden layers: tanh(x @ W + b)   (all lane-padded; padded units stay 0)
    for _ in range(num_hidden):
        w_ref, b_ref = refs[idx], refs[idx + 1]
        idx += 2
        h = jnp.tanh(
            jnp.dot(h, w_ref[...], preferred_element_type=jnp.float32)
            + b_ref[...]
        )
    w_mu_ref, b_mu_ref = refs[idx], refs[idx + 1]
    mu_ref = refs[idx + 2]
    mu_ref[...] = (
        jnp.dot(h, w_mu_ref[...], preferred_element_type=jnp.float32)
        + b_mu_ref[...]
    )


def prepare_params(params, min_log_std):
    """One-time parameter prep (do this at init / after update_params).

    params: dict with PyTorch-convention entries 'layer{i}.weight' (out, in),
            'layer{i}.bias' (out,), 'mu.weight', 'mu.bias', 'sigma'.
    Returns a dict holding lane-padded kernel params, the precomputed scale,
    and shape metadata consumed by the forward.
    """
    num_hidden = sum(
        1 for k in params if k.startswith("layer") and k.endswith(".weight")
    )
    output_size = params["mu.weight"].shape[0]
    if num_hidden:
        input_size = params["layer1.weight"].shape[1]
    else:
        input_size = params["mu.weight"].shape[1]

    kernel_params = []
    prev = input_size  # in-dim of first layer stays unpadded (matches x)
    for i in range(1, num_hidden + 1):
        w = params[f"layer{i}.weight"].astype(jnp.float32).T        # (in, out)
        b = params[f"layer{i}.bias"].astype(jnp.float32).reshape(1, -1)
        out = w.shape[1]
        out_pad = _round_up(out, 128)
        w = jnp.pad(w, ((0, prev - w.shape[0]), (0, out_pad - out)))
        b = jnp.pad(b, ((0, 0), (0, out_pad - out)))
        kernel_params += [w, b]
        prev = out_pad

    w_mu = params["mu.weight"].astype(jnp.float32).T                # (in, out)
    b_mu = params["mu.bias"].astype(jnp.float32).reshape(1, -1)
    out_pad = _round_up(output_size, 128)
    w_mu = jnp.pad(w_mu, ((0, prev - w_mu.shape[0]), (0, out_pad - output_size)))
    b_mu = jnp.pad(b_mu, ((0, 0), (0, out_pad - output_size)))
    kernel_params += [w_mu, b_mu]

    # scale does not depend on x -> compute once, outside the kernel.
    scale = jnp.exp(
        jnp.maximum(params["sigma"].astype(jnp.float32), jnp.float32(min_log_std))
    )

    return {
        "kernel_params": [jax.device_put(p) for p in kernel_params],
        "scale": jax.device_put(scale),
        "num_hidden": num_hidden,
        "input_size": input_size,
        "output_size": output_size,
        "out_pad": out_pad,
    }


def normal_policy_forward(x, prepped, tile_b=512):
    """Runs the MLP + mu head in one batch-gridded Pallas kernel.

    Returns (mu, scale): mu (batch, output_size), scale (output_size,), i.e.
    the parameters of Independent(Normal(mu, scale), 1).
    """
    batch = x.shape[0]
    x = x.astype(jnp.float32)

    num_hidden = prepped["num_hidden"]
    in_features = prepped["input_size"]
    out_pad = prepped["out_pad"]
    kparams = prepped["kernel_params"]

    # Batch tiling: >=8 (sublane), up to tile_b rows per grid step.
    batch8 = _round_up(batch, 8)
    tile = min(_round_up(tile_b, 8), batch8)
    batch_pad = _round_up(batch, tile)
    if batch_pad != batch:
        x = jnp.pad(x, ((0, batch_pad - batch), (0, 0)))

    grid = (batch_pad // tile,)

    in_specs = [pl.BlockSpec((tile, in_features), lambda i: (i, 0))]
    for p in kparams:
        # Full-array blocks, constant index_map -> weights stay resident in
        # VMEM across all batch tiles.
        in_specs.append(pl.BlockSpec(p.shape, lambda i: (0, 0)))
    out_spec = pl.BlockSpec((tile, out_pad), lambda i: (i, 0))

    mu_pad = pl.pallas_call(
        functools.partial(_policy_kernel, num_hidden),
        out_shape=jax.ShapeDtypeStruct((batch_pad, out_pad), jnp.float32),
        grid=grid,
        in_specs=in_specs,
        out_specs=out_spec,
        compiler_params=pltpu.CompilerParams(
            dimension_semantics=("parallel",)
        ),
    )(x, *kparams)

    mu = mu_pad[:batch, : prepped["output_size"]]
    return mu, prepped["scale"]


def build_forward(prepped, tile_b=512):
    """Returns a jitted x -> (mu, scale) closure: pad + kernel + slice fuse
    into one compiled program (no per-call Python overhead on the hot path)."""
    @jax.jit
    def fwd(x):
        return normal_policy_forward(x, prepped, tile_b=tile_b)
    return fwd


def init_normal_policy_params(key, input_size, output_size, hidden_layer_size=(),
                              init_std=1.0):
    """Deterministic init mirroring the PyTorch module:
    xavier_uniform_ on Linear weights, zero biases, sigma filled with log(init_std)."""
    params = {}
    layer_sizes = (input_size,) + tuple(hidden_layer_size)
    num_layers = len(hidden_layer_size) + 1
    for i in range(1, num_layers):
        fan_in, fan_out = layer_sizes[i - 1], layer_sizes[i]
        key, sub = jax.random.split(key)
        a = math.sqrt(6.0 / (fan_in + fan_out))
        params[f"layer{i}.weight"] = jax.random.uniform(
            sub, (fan_out, fan_in), jnp.float32, -a, a)
        params[f"layer{i}.bias"] = jnp.zeros((fan_out,), jnp.float32)
    fan_in, fan_out = layer_sizes[-1], output_size
    key, sub = jax.random.split(key)
    a = math.sqrt(6.0 / (fan_in + fan_out))
    params["mu.weight"] = jax.random.uniform(sub, (fan_out, fan_in), jnp.float32, -a, a)
    params["mu.bias"] = jnp.zeros((fan_out,), jnp.float32)
    params["sigma"] = jnp.full((output_size,), math.log(init_std), jnp.float32)
    return params


def _reference_forward(x, params, min_log_std):
    """Pure-JAX reference of NormalPolicy.forward (distribution params)."""
    num_hidden = sum(
        1 for k in params if k.startswith("layer") and k.endswith(".weight")
    )
    h = x
    for i in range(1, num_hidden + 1):
        h = jnp.tanh(h @ params[f"layer{i}.weight"].T + params[f"layer{i}.bias"])
    mu = h @ params["mu.weight"].T + params["mu.bias"]
    scale = jnp.abs(jnp.exp(jnp.maximum(params["sigma"], min_log_std)))
    return mu, scale


if __name__ == "__main__":
    input_size = 32
    hidden_layer_size = (32,)
    output_size = 8
    batch = 8
    min_std = 1e-6
    min_log_std = math.log(min_std)

    key = jax.random.PRNGKey(0)
    key, pkey, xkey = jax.random.split(key, 3)
    params = init_normal_policy_params(pkey, input_size, output_size,
                                       hidden_layer_size, init_std=1.0)
    x = jax.random.normal(xkey, (batch, input_size), jnp.float32)

    prepped = prepare_params(params, min_log_std)   # one-time, off the hot path
    forward = build_forward(prepped)                # jitted hot path
    mu, scale = forward(x)
    jax.block_until_ready((mu, scale))

    mu_ref, scale_ref = _reference_forward(x, params, min_log_std)
    assert mu.shape == (batch, output_size)
    assert scale.shape == (output_size,)
    assert jnp.allclose(mu, mu_ref, atol=1e-5, rtol=1e-5)
    assert jnp.allclose(scale, scale_ref, atol=1e-6, rtol=1e-6)

    print("KERNEL_OK")
</pallas_src>

<mosaic_0001>
module attributes {stable_mosaic.version = 11 : i64} {
  func.func @_policy_kernel(%arg0: i32, %arg1: memref<8x32xf32, #tpu.memory_space<vmem>>, %arg2: memref<32x128xf32, #tpu.memory_space<vmem>>, %arg3: memref<1x128xf32, #tpu.memory_space<vmem>>, %arg4: memref<128x128xf32, #tpu.memory_space<vmem>>, %arg5: memref<1x128xf32, #tpu.memory_space<vmem>>, %arg6: memref<8x128xf32, #tpu.memory_space<vmem>>) attributes {dimension_semantics = [#tpu.dimension_semantics<parallel>], iteration_bounds = array<i64: 1>, scalar_prefetch = 0 : i64, scratch_operands = 0 : i64, tpu.core_type = #tpu.core_type<tc>, window_params = [{transform_indices = @transform_0, window_bounds = array<i64: 8, 32>}, {pipeline_mode = #tpu.pipeline_mode<synchronous>, transform_indices = @transform_1, window_bounds = array<i64: 32, 128>}, {pipeline_mode = #tpu.pipeline_mode<synchronous>, transform_indices = @transform_2, window_bounds = array<i64: 1, 128>}, {pipeline_mode = #tpu.pipeline_mode<synchronous>, transform_indices = @transform_3, window_bounds = array<i64: 128, 128>}, {pipeline_mode = #tpu.pipeline_mode<synchronous>, transform_indices = @transform_4, window_bounds = array<i64: 1, 128>}, {transform_indices = @transform_5, window_bounds = array<i64: 8, 128>}]} {
    %c0 = arith.constant 0 : index
    %c0_0 = arith.constant 0 : index
    %0 = vector.load %arg1[%c0, %c0_0] : memref<8x32xf32, #tpu.memory_space<vmem>>, vector<8x32xf32>
    %c0_1 = arith.constant 0 : index
    %c0_2 = arith.constant 0 : index
    %1 = vector.load %arg2[%c0_1, %c0_2] : memref<32x128xf32, #tpu.memory_space<vmem>>, vector<32x128xf32>
    %cst = arith.constant dense<0.000000e+00> : vector<8x128xf32>
    %2 = tpu.matmul %0, %1, %cst {dimension_numbers = #tpu.dot_dimension_numbers<[1], [0], [0], [1], [0, 0, 1, 1], [], []>} : vector<8x32xf32>, vector<32x128xf32>, vector<8x128xf32> -> vector<8x128xf32>
    %c0_3 = arith.constant 0 : index
    %c0_4 = arith.constant 0 : index
    %3 = vector.load %arg3[%c0_3, %c0_4] : memref<1x128xf32, #tpu.memory_space<vmem>>, vector<1x128xf32>
    %4 = vector.broadcast %3 : vector<1x128xf32> to vector<8x128xf32>
    %5 = arith.addf %2, %4 : vector<8x128xf32>
    %6 = math.tanh %5 : vector<8x128xf32>
    %c0_5 = arith.constant 0 : index
    %c0_6 = arith.constant 0 : index
    %7 = vector.load %arg4[%c0_5, %c0_6] : memref<128x128xf32, #tpu.memory_space<vmem>>, vector<128x128xf32>
    %cst_7 = arith.constant dense<0.000000e+00> : vector<8x128xf32>
    %8 = tpu.matmul %6, %7, %cst_7 {dimension_numbers = #tpu.dot_dimension_numbers<[1], [0], [0], [1], [0, 0, 1, 1], [], []>} : vector<8x128xf32>, vector<128x128xf32>, vector<8x128xf32> -> vector<8x128xf32>
    %c0_8 = arith.constant 0 : index
    %c0_9 = arith.constant 0 : index
    %9 = vector.load %arg5[%c0_8, %c0_9] : memref<1x128xf32, #tpu.memory_space<vmem>>, vector<1x128xf32>
    %10 = vector.broadcast %9 : vector<1x128xf32> to vector<8x128xf32>
    %11 = arith.addf %8, %10 : vector<8x128xf32>
    %c0_10 = arith.constant 0 : index
    %c0_11 = arith.constant 0 : index
    %12 = vector.load %arg6[%c0_10, %c0_11] : memref<8x128xf32, #tpu.memory_space<vmem>>, vector<8x128xf32>
    tpu.vector_store %arg6[%c0_10, %c0_11], %11 {strides = array<i32>} : memref<8x128xf32, #tpu.memory_space<vmem>>, vector<8x128xf32>,
    return
  }
  func.func @transform_0(%arg0: i32) -> (i32, i32) {
    %c0_i32 = arith.constant 0 : i32
    %c0_i32_0 = arith.constant 0 : i32
    return %arg0, %c0_i32 : i32, i32
  }
  func.func @transform_1(%arg0: i32) -> (i32, i32) {
    %c0_i32 = arith.constant 0 : i32
    %c0_i32_0 = arith.constant 0 : i32
    %c0_i32_1 = arith.constant 0 : i32
    return %c0_i32, %c0_i32_0 : i32, i32
  }
  func.func @transform_2(%arg0: i32) -> (i32, i32) {
    %c0_i32 = arith.constant 0 : i32
    %c0_i32_0 = arith.constant 0 : i32
    %c0_i32_1 = arith.constant 0 : i32
    return %c0_i32, %c0_i32_0 : i32, i32
  }
  func.func @transform_3(%arg0: i32) -> (i32, i32) {
    %c0_i32 = arith.constant 0 : i32
    %c0_i32_0 = arith.constant 0 : i32
    %c0_i32_1 = arith.constant 0 : i32
    return %c0_i32, %c0_i32_0 : i32, i32
  }
  func.func @transform_4(%arg0: i32) -> (i32, i32) {
    %c0_i32 = arith.constant 0 : i32
    %c0_i32_0 = arith.constant 0 : i32
    %c0_i32_1 = arith.constant 0 : i32
    return %c0_i32, %c0_i32_0 : i32, i32
  }
  func.func @transform_5(%arg0: i32) -> (i32, i32) {
    %c0_i32 = arith.constant 0 : i32
    %c0_i32_0 = arith.constant 0 : i32
    return %arg0, %c0_i32 : i32, i32
  }
}

</mosaic_0001>

<bundles_post_ra>
// kernel: fwd.1
= control target key start
LH: loop header
LB: loop body
LE: loop exit
PB: predicated region body
PF: predicated region fallthrough
CT: control target
= control target key end

     0   :  { %10 = vsyncpa [#allocation3], 0  ;;  %s502_s0 = inlined_call_operand.hbm [shape: f32[8,32], index: 0, kind: input, shape index: {}]   ;;  %s503_s1 = inlined_call_operand.hbm [shape: f32[32,128], index: 1, kind: input, shape index: {}]   ;;  %s504_s2 = inlined_call_operand.vmem [shape: f32[1,128], index: 2, kind: input, shape index: {}, may-alias: {2,4}]   ;;  %s505_s3 = inlined_call_operand.hbm [shape: f32[128,128], index: 3, kind: input, shape index: {}]   ;;  %s506_s4 = inlined_call_operand.vmem [shape: f32[1,128], index: 4, kind: input, shape index: {}, may-alias: {2,4}]   ;;  %s507_s5 = inlined_call_operand.hbm [shape: f32[8,128], index: 5, kind: output, shape index: {}]  }
   0x1   :  { %11 = vsyncpa [#allocation6], 0 }
   0x2   :  { %12 = vsyncpa [#allocation4], 0  ;;  %s424_s18 = smov [#allocation5]  }
   0x3   :  { %s28_s19 = sshll.u32 %s424_s18, 4  ;;  %s29_s19 = int_to_ptr.vmem [resolvable:$true] %s28_s19 }
   0x4   :  { %s346_s20 = scalar_lea.vmem %s29_s19, 512  ;;  %p351_p1 = scmp.lt.s32.totalorder %s29_s19, %s29_s19 }
   0x5   :  { %p347_p0 = scmp.ne.s32.totalorder %s29_s19, %s346_s20  ;;  %p352_p2 = scmp.lt.s32.totalorder %s346_s20, %s346_s20 }
   0x7   :  { %p353_p3 = por %p352_p2, %p351_p1 }
   0x9   :  { %p354_p4 = pnand %p353_p3, %p347_p0 }
   0xb   :  { %357 = shalt.err (!%p354_p4)
}
   0xc   :  { %s425_s21 = smov 128   ;;  %s426_s22 = smov 8  }
   0xd   :  { %34 = dma.hbm_to_vmem [thread:$0]  %s503_s1, 512, %s29_s19, [#allocation6], %s425_s21, %s425_s21, %s426_s22  }
   0xe   :  { %s427_s25 = smov [#allocation2]   ;;  %s428_s27 = smov [#allocation7]  }
   0xf   :  { %s19_s26 = sshll.u32 %s427_s25, 4  ;;  %s42_s28 = sshll.u32 %s428_s27, 4  ;;  %s20_s26 = int_to_ptr.vmem [resolvable:$true] %s19_s26  ;;  %s43_s28 = int_to_ptr.vmem [resolvable:$true] %s42_s28 }
  0x10   :  { %s366_s29 = scalar_lea.vmem %s20_s26, 128  ;;  %p371_p6 = scmp.lt.s32.totalorder %s20_s26, %s20_s26 }
  0x11   :  { %p367_p5 = scmp.ne.s32.totalorder %s20_s26, %s366_s29  ;;  %p372_p7 = scmp.lt.s32.totalorder %s366_s29, %s366_s29 }
  0x13   :  { %p373_p8 = por %p372_p7, %p371_p6 }
  0x15   :  { %p374_p9 = pnand %p373_p8, %p367_p5 }
  0x17   :  { %377 = shalt.err (!%p374_p9)
}
  0x18   :  { %22 = dma.hbm_to_vmem [thread:$0]  %s502_s0, 128, %s20_s26, [#allocation3]  }
  0x19   :  { %s386_s7 = scalar_lea.vmem %s43_s28, 2048  ;;  %p391_p11 = scmp.lt.s32.totalorder %s43_s28, %s43_s28 }
  0x1a   :  { %p387_p10 = scmp.ne.s32.totalorder %s43_s28, %s386_s7  ;;  %p392_p12 = scmp.lt.s32.totalorder %s386_s7, %s386_s7 }
  0x1c   :  { %p393_p13 = por %p392_p12, %p391_p11 }
  0x1e   :  { %p394_p0 = pnand %p393_p13, %p387_p10 }
  0x20   :  { %397 = shalt.err (!%p394_p0)
}
  0x21   :  { %48 = dma.hbm_to_vmem [thread:$0]  %s505_s3, 2048, %s43_s28, [#allocation6], %s425_s21, %s425_s21, %s426_s22  }
  0x22   :  { %418 = dma.done.wait [#allocation3], 128  }
  0x23   :  { %419 = vsyncadd [#allocation3], 4294967168 }
  0x24   :  { %420 = dma.done.wait [#allocation6], 2560  }
  0x25   :  { %421 = vsyncadd [#allocation6], 4294964736  ;;  %v429_v0 = vmov 0.0   ;;  %vm430_vm0 = vmmov 0   ;;  %v64_v1 = vld [vmem:[#allocation5 + $0x18] sm:$0xff]  ;;  %v63_v2 = vld [vmem:[#allocation5 + $0x10] sm:$0xff] }
  0x26   :  { %282 = vmatprep.subr.mxu0 %v429_v0  ;;  %290 = vmatprep.mubr.msk.f32.mxu0 %vm430_vm0, %v429_v0  ;;  %v162_v3 = vld [vmem:[#allocation7 + $0x78] sm:$0xff]  ;;  %v62_v4 = vld [vmem:[#allocation5 + $0x8] sm:$0xff]  ;;  %v161_v5 = vld [vmem:[#allocation7 + $0x70] sm:$0xff]  ;;  %vm72_vm1 = vcmask 261120   ;;  %s431_s11 = smov [#allocation8]  }
  0x27   :  { %293 = vmatprep.subr.mxu1 %v429_v0  ;;  %325 = vmatprep.mubr.msk.f32.mxu1 %vm430_vm0, %v429_v0  ;;  %v160_v6 = vld [vmem:[#allocation7 + $0x68] sm:$0xff]  ;;  %v61_v7 = vld [vmem:[#allocation5] sm:$0xff]  ;;  %v60_v8 = vld [vmem:[#allocation2] sm:$0xff]  ;;  %s247_s12 = sshll.u32 %s431_s11, 4  ;;  %s248_s12 = int_to_ptr.vmem [resolvable:$true] %s247_s12 }
  0x28   :  { %283 = vmatpush3.msra.mxu0 %v64_v1  ;;  %294 = vmatpush3.msra.mxu1 %v162_v3  ;;  %v159_v9 = vld [vmem:[#allocation7 + $0x60] sm:$0xff]  ;;  %v158_v10 = vld [vmem:[#allocation7 + $0x58] sm:$0xff]  ;;  %v157_v11 = vld [vmem:[#allocation7 + $0x50] sm:$0xff]  ;;  %s398_s13 = scalar_lea.vmem %s248_s12, 128  ;;  %p403_p2 = scmp.lt.s32.totalorder %s248_s12, %s248_s12 }
  0x29   :  { %284 = vmatprep.subr.mxu0 %v429_v0  ;;  %295 = vmatprep.subr.mxu1 %v429_v0  ;;  %v156_v12 = vld [vmem:[#allocation7 + $0x48] sm:$0xff]  ;;  %v155_v13 = vld [vmem:[#allocation7 + $0x40] sm:$0xff]  ;;  %v154_v14 = vld [vmem:[#allocation7 + $0x38] sm:$0xff]  ;;  %p399_p1 = scmp.ne.s32.totalorder %s248_s12, %s398_s13  ;;  %p404_p3 = scmp.lt.s32.totalorder %s398_s13, %s398_s13 }
  0x2a   :  { %285 = vmatpush3.msra.mxu0 %v63_v2  ;;  %296 = vmatpush3.msra.mxu1 %v161_v5  ;;  %v153_v15 = vld [vmem:[#allocation7 + $0x30] sm:$0xff]  ;;  %v152_v16 = vld [vmem:[#allocation7 + $0x28] sm:$0xff]  ;;  %v151_v17 = vld [vmem:[#allocation7 + $0x20] sm:$0xff] }
  0x2b   :  { %286 = vmatprep.subr.mxu0 %v429_v0  ;;  %297 = vmatprep.subr.mxu1 %v429_v0  ;;  %v150_v18 = vld [vmem:[#allocation7 + $0x18] sm:$0xff]  ;;  %v149_v19 = vld [vmem:[#allocation7 + $0x10] sm:$0xff]  ;;  %v148_v20 = vld [vmem:[#allocation7 + $0x8] sm:$0xff]  ;;  %p405_p4 = por %p404_p3, %p403_p2 }
  0x2c   :  { %287 = vmatpush3.msra.mxu0 %v62_v4  ;;  %298 = vmatpush3.msra.mxu1 %v160_v6  ;;  %v147_v21 = vld [vmem:[#allocation7] sm:$0xff]  ;;  %v257_v22 = vld [vmem:[%s504_s2] ss:$0 sm:$0xff] }
  0x2d   :  { %288 = vmatprep.subr.mxu0 %v429_v0  ;;  %299 = vmatprep.subr.mxu1 %v429_v0  ;;  %v259_v27 = vld [vmem:[%s506_s4] ss:$0 sm:$0xff]  ;;  %p406_p5 = pnand %p405_p4, %p399_p1 }
  0x2e   :  { %289 = vmatpush3.msra.mxu0 %v61_v7  ;;  %300 = vmatpush3.msra.mxu1 %v159_v9 }
  0x2f   :  { %291 = vmatmul.mubr.msk.f32.vlgmr.msra.gmra.mxu0 %vm72_vm1, %v60_v8  ;;  %301 = vmatprep.subr.mxu1 %v429_v0 }
  0x30   :  { %302 = vmatpush3.msra.mxu1 %v158_v10 }
  0x31   :  { %303 = vmatprep.subr.mxu1 %v429_v0 }
  0x32   :  { %304 = vmatpush3.msra.mxu1 %v157_v11 }
  0x33   :  { %305 = vmatprep.subr.mxu1 %v429_v0 }
  0x34   :  { %306 = vmatpush3.msra.mxu1 %v156_v12 }
  0x35   :  { %307 = vmatprep.subr.mxu1 %v429_v0 }
  0x36   :  { %308 = vmatpush3.msra.mxu1 %v155_v13 }
  0x37   :  { %309 = vmatprep.subr.mxu1 %v429_v0 }
  0x38   :  { %310 = vmatpush3.msra.mxu1 %v154_v14 }
  0x39   :  { %311 = vmatprep.subr.mxu1 %v429_v0 }
  0x3a   :  { %312 = vmatpush3.msra.mxu1 %v153_v15 }
  0x3b   :  { %313 = vmatprep.subr.mxu1 %v429_v0 }
  0x3c   :  { %314 = vmatpush3.msra.mxu1 %v152_v16 }
  0x3d   :  { %315 = vmatprep.subr.mxu1 %v429_v0 }
  0x3e   :  { %316 = vmatpush3.msra.mxu1 %v151_v17 }
  0x3f   :  { %317 = vmatprep.subr.mxu1 %v429_v0 }
  0x40   :  { %318 = vmatpush3.msra.mxu1 %v150_v18 }
  0x41   :  { %319 = vmatprep.subr.mxu1 %v429_v0 }
  0x42   :  { %320 = vmatpush3.msra.mxu1 %v149_v19 }
  0x43   :  { %321 = vmatprep.subr.mxu1 %v429_v0 }
  0x44   :  { %322 = vmatpush3.msra.mxu1 %v148_v20 }
  0x45   :  { %323 = vmatprep.subr.mxu1 %v429_v0 }
  0x46   :  { %324 = vmatpush3.msra.mxu1 %v147_v21 }
  0xef   :  { %v142_v23 = vpop.f32.mrf.mxu0 }
  0xf0   :  { %v143_v24 = vadd.f32 %v257_v22, %v142_v23 }
  0xf1   :  { %v292_v25 = vpop.f32.mrf.mxu0 }
  0xf2   :  { %336 = vtanh.f32 %v143_v24 }
  0xff   :  { %v337_v26 = vpop.eup %336 }
 0x100   :  { %326 = vmatmul.mubr.f32.vlgmr.msra.gmra.mxu1 %v337_v26 }
 0x1c0   :  { %v236_v28 = vpop.f32.mrf.mxu1 }
 0x1c1   :  { %v237_v29 = vadd.f32 %v259_v27, %v236_v28 }
 0x1c2   :  { %v327_v30 = vpop.f32.mrf.mxu1 }
 0x1c3   :  { %240 = vst [vmem:[#allocation8] sm:$0xff] %v237_v29 }
 0x1c4   :  { %409 = shalt.err (!%p406_p5)
}
 0x1c5   :  { %250 = dma.vmem_to_hbm [thread:$0]  %s248_s12, 128, %s507_s5, [#allocation4]  }
 0x1c6   :  { %422 = dma.done.wait [#allocation4], 128  }
 0x1c7   :  { %423 = vsyncadd [#allocation4], 4294967168 }
 0x1c8   :  { %254 = vsyncpa [#allocation3], 1 }
 0x1c9   :  { %255 = vsyncpa [#allocation6], 1 }
 0x1ca   :  { %256 = vsyncpa [#allocation4], 1 }

</bundles_post_ra>
